<compile_context>
chip_gen: v7x
topology: tpu7x:2x2x1
jax: 0.10.0
libtpu: 0.0.40
codegen_flags: <defaults>
</compile_context>

<pallas_src>
import functools

import jax
import jax.numpy as jnp
from jax import lax
from jax.experimental import pallas as pl
from jax.experimental.pallas import tpu as pltpu


# ---------------------------------------------------------------------------
# Fused kernel: LayerNorm + QKV + causal multi-head attention + out-projection
# (one grid step per batch element; all heads inside the step)
# ---------------------------------------------------------------------------
def fused_attention_kernel(x_ref, gamma_ref, beta_ref, wqkv_ref, wout_ref,
                           bout_ref, o_ref, *, heads, dim_head, scale):
    x = x_ref[0]                                          # (N, D) fp32
    n = x.shape[0]
    inner = heads * dim_head

    # ---- LayerNorm (eps = 1e-5, affine) -----------------------------------
    mean = jnp.mean(x, axis=-1, keepdims=True)
    var = jnp.mean((x - mean) ** 2, axis=-1, keepdims=True)
    xn = (x - mean) * lax.rsqrt(var + 1e-5)
    xn = xn * gamma_ref[...] + beta_ref[...]              # (N, D)

    # ---- QKV projection (no bias), lane-dense (N, 3*inner) ----------------
    qkv = jnp.dot(xn, wqkv_ref[...], preferred_element_type=jnp.float32)
    q = qkv[:, :inner] * scale                            # scale folded into q
    k = qkv[:, inner:2 * inner]
    v = qkv[:, 2 * inner:]

    # ---- causal mask: built once, reused for every head --------------------
    row = lax.broadcasted_iota(jnp.int32, (n, n), 0)
    col = lax.broadcasted_iota(jnp.int32, (n, n), 1)
    causal = col <= row

    w_out = wout_ref[...]                                 # (inner, D)

    # ---- all heads in this grid step; head-merge fused into the output
    #      projection:  concat_h(o_h) @ W_out == sum_h o_h @ W_out[h] ---------
    acc = jnp.zeros((n, w_out.shape[1]), jnp.float32)     # (N, D)
    for h in range(heads):                                # static unroll
        lo, hi = h * dim_head, (h + 1) * dim_head
        qh, kh, vh = q[:, lo:hi], k[:, lo:hi], v[:, lo:hi]          # (N, dh)
        s = jnp.dot(qh, kh.T, preferred_element_type=jnp.float32)   # (N, N)
        s = jnp.where(causal, s, -1e30)                   # large-neg, not -inf
        s = s - jnp.max(s, axis=-1, keepdims=True)
        p = jnp.exp(s)
        p = p * pl.reciprocal(jnp.sum(p, axis=-1, keepdims=True), approx=True)
        oh = jnp.dot(p, vh, preferred_element_type=jnp.float32)     # (N, dh)
        acc = acc + jnp.dot(oh, w_out[lo:hi, :],
                            preferred_element_type=jnp.float32)     # (N, D)

    o_ref[0] = acc + bout_ref[...]                        # single lane-dense store


# ---------------------------------------------------------------------------
# Wrapper
# ---------------------------------------------------------------------------
def attention_forward(x, params, *, heads, dim_head):
    B, N, D = x.shape
    inner = heads * dim_head

    gamma = params["gamma"].reshape(1, D)
    beta = params["beta"].reshape(1, D)
    w_qkv = params["w_qkv"]                               # (D, 3*inner)
    w_out = params["w_out"]                               # (inner, D)
    b_out = params["b_out"].reshape(1, D)

    kernel = functools.partial(fused_attention_kernel, heads=heads,
                               dim_head=dim_head, scale=dim_head ** (-0.5))

    return pl.pallas_call(
        kernel,
        out_shape=jax.ShapeDtypeStruct((B, N, D), jnp.float32),
        grid=(B,),
        in_specs=[
            pl.BlockSpec((1, N, D), lambda b: (b, 0, 0)),          # x (per-batch)
            pl.BlockSpec((1, D), lambda b: (0, 0)),                # gamma (resident)
            pl.BlockSpec((1, D), lambda b: (0, 0)),                # beta
            pl.BlockSpec((D, 3 * inner), lambda b: (0, 0)),        # W_qkv
            pl.BlockSpec((inner, D), lambda b: (0, 0)),            # W_out
            pl.BlockSpec((1, D), lambda b: (0, 0)),                # b_out
        ],
        out_specs=pl.BlockSpec((1, N, D), lambda b: (b, 0, 0)),
        compiler_params=pltpu.CompilerParams(
            dimension_semantics=("parallel",)),                    # v7x: 2 TCs
    )(x, gamma, beta, w_qkv, w_out, b_out)


# ---------------------------------------------------------------------------
# Pure-JAX reference (for verification)
# ---------------------------------------------------------------------------
def attention_reference(x, params, *, heads, dim_head):
    B, N, D = x.shape
    inner = heads * dim_head
    mean = jnp.mean(x, axis=-1, keepdims=True)
    var = jnp.mean((x - mean) ** 2, axis=-1, keepdims=True)
    xn = (x - mean) / jnp.sqrt(var + 1e-5) * params["gamma"] + params["beta"]
    qkv = xn @ params["w_qkv"]
    q, k, v = jnp.split(qkv, 3, axis=-1)
    q, k, v = (t.reshape(B, N, heads, dim_head).transpose(0, 2, 1, 3)
               for t in (q, k, v))
    s = jnp.einsum("bhnd,bhmd->bhnm", q, k) * (dim_head ** -0.5)
    mask = jnp.tril(jnp.ones((N, N), dtype=bool))
    s = jnp.where(mask, s, -jnp.inf)
    p = jax.nn.softmax(s, axis=-1)
    o = jnp.einsum("bhnm,bhmd->bhnd", p, v)
    o = o.transpose(0, 2, 1, 3).reshape(B, N, inner)
    return o @ params["w_out"] + params["b_out"]


# ---------------------------------------------------------------------------
if __name__ == "__main__":
    # Small shapes consistent with the module: dim=32, heads=4, dim_head=16
    B, N, D = 2, 8, 32
    HEADS, DIM_HEAD = 4, 16
    INNER = HEADS * DIM_HEAD

    key = jax.random.PRNGKey(0)
    kx, kq, ko, kb = jax.random.split(key, 4)

    x = jax.random.normal(kx, (B, N, D), dtype=jnp.float32)

    # Deterministic synthetic parameters (shapes follow the module's __init__).
    params = {
        "gamma": jnp.ones((D,), jnp.float32),
        "beta": jnp.zeros((D,), jnp.float32),
        "w_qkv": jax.random.normal(kq, (D, 3 * INNER), jnp.float32) * (D ** -0.5),
        "w_out": jax.random.normal(ko, (INNER, D), jnp.float32) * (INNER ** -0.5),
        "b_out": jax.random.normal(kb, (D,), jnp.float32) * 0.01,
    }

    y = attention_forward(x, params, heads=HEADS, dim_head=DIM_HEAD)
    y = jax.block_until_ready(y)

    y_ref = attention_reference(x, params, heads=HEADS, dim_head=DIM_HEAD)
    assert y.shape == (B, N, D)
    # Tolerance loosened (vs 1e-4) because the softmax denominator now uses the
    # EUP approximate reciprocal (pl.reciprocal(..., approx=True)).
    assert jnp.allclose(y, y_ref, atol=5e-3, rtol=5e-3), "mismatch vs reference"

    print("KERNEL_OK")
</pallas_src>

<mosaic_0001>
module attributes {stable_mosaic.version = 11 : i64} {
  func.func @fused_attention_kernel(%arg0: i32, %arg1: memref<1x8x32xf32, #tpu.memory_space<vmem>>, %arg2: memref<1x32xf32, #tpu.memory_space<vmem>>, %arg3: memref<1x32xf32, #tpu.memory_space<vmem>>, %arg4: memref<32x192xf32, #tpu.memory_space<vmem>>, %arg5: memref<64x32xf32, #tpu.memory_space<vmem>>, %arg6: memref<1x32xf32, #tpu.memory_space<vmem>>, %arg7: memref<1x8x32xf32, #tpu.memory_space<vmem>>) attributes {dimension_semantics = [#tpu.dimension_semantics<parallel>], iteration_bounds = array<i64: 2>, scalar_prefetch = 0 : i64, scratch_operands = 0 : i64, tpu.core_type = #tpu.core_type<tc>, window_params = [{transform_indices = @transform_0, window_bounds = array<i64: 1, 8, 32>}, {pipeline_mode = #tpu.pipeline_mode<synchronous>, transform_indices = @transform_1, window_bounds = array<i64: 1, 32>}, {pipeline_mode = #tpu.pipeline_mode<synchronous>, transform_indices = @transform_2, window_bounds = array<i64: 1, 32>}, {pipeline_mode = #tpu.pipeline_mode<synchronous>, transform_indices = @transform_3, window_bounds = array<i64: 32, 192>}, {pipeline_mode = #tpu.pipeline_mode<synchronous>, transform_indices = @transform_4, window_bounds = array<i64: 64, 32>}, {pipeline_mode = #tpu.pipeline_mode<synchronous>, transform_indices = @transform_5, window_bounds = array<i64: 1, 32>}, {transform_indices = @transform_6, window_bounds = array<i64: 1, 8, 32>}]} {
    %c0 = arith.constant 0 : index
    %c0_0 = arith.constant 0 : index
    %c0_1 = arith.constant 0 : index
    %0 = vector.load %arg1[%c0, %c0_0, %c0_1] : memref<1x8x32xf32, #tpu.memory_space<vmem>>, vector<1x8x32xf32>
    %1 = vector.shape_cast %0 : vector<1x8x32xf32> to vector<8x32xf32>
    %cst = arith.constant dense<0.000000e+00> : vector<8xf32>
    %2 = vector.multi_reduction <add>, %1, %cst [1] : vector<8x32xf32> to vector<8xf32>
    %3 = vector.shape_cast %2 : vector<8xf32> to vector<8x1xf32>
    %cst_2 = arith.constant 3.200000e+01 : f32
    %4 = vector.broadcast %cst_2 : f32 to vector<8x1xf32>
    %5 = arith.divf %3, %4 : vector<8x1xf32>
    %6 = vector.broadcast %5 : vector<8x1xf32> to vector<8x32xf32>
    %7 = arith.subf %1, %6 : vector<8x32xf32>
    %8 = arith.mulf %7, %7 : vector<8x32xf32>
    %cst_3 = arith.constant dense<0.000000e+00> : vector<8xf32>
    %9 = vector.multi_reduction <add>, %8, %cst_3 [1] : vector<8x32xf32> to vector<8xf32>
    %10 = vector.shape_cast %9 : vector<8xf32> to vector<8x1xf32>
    %cst_4 = arith.constant 3.200000e+01 : f32
    %11 = vector.broadcast %cst_4 : f32 to vector<8x1xf32>
    %12 = arith.divf %10, %11 : vector<8x1xf32>
    %13 = vector.broadcast %5 : vector<8x1xf32> to vector<8x32xf32>
    %14 = arith.subf %1, %13 : vector<8x32xf32>
    %cst_5 = arith.constant 9.99999974E-6 : f32
    %15 = vector.broadcast %cst_5 : f32 to vector<8x1xf32>
    %16 = arith.addf %12, %15 : vector<8x1xf32>
    %17 = math.rsqrt %16 : vector<8x1xf32>
    %18 = vector.broadcast %17 : vector<8x1xf32> to vector<8x32xf32>
    %19 = arith.mulf %14, %18 : vector<8x32xf32>
    %c0_6 = arith.constant 0 : index
    %c0_7 = arith.constant 0 : index
    %20 = vector.load %arg2[%c0_6, %c0_7] : memref<1x32xf32, #tpu.memory_space<vmem>>, vector<1x32xf32>
    %21 = vector.broadcast %20 : vector<1x32xf32> to vector<8x32xf32>
    %22 = arith.mulf %19, %21 : vector<8x32xf32>
    %c0_8 = arith.constant 0 : index
    %c0_9 = arith.constant 0 : index
    %23 = vector.load %arg3[%c0_8, %c0_9] : memref<1x32xf32, #tpu.memory_space<vmem>>, vector<1x32xf32>
    %24 = vector.broadcast %23 : vector<1x32xf32> to vector<8x32xf32>
    %25 = arith.addf %22, %24 : vector<8x32xf32>
    %c0_10 = arith.constant 0 : index
    %c0_11 = arith.constant 0 : index
    %26 = vector.load %arg4[%c0_10, %c0_11] : memref<32x192xf32, #tpu.memory_space<vmem>>, vector<32x192xf32>
    %cst_12 = arith.constant dense<0.000000e+00> : vector<8x192xf32>
    %27 = tpu.matmul %25, %26, %cst_12 {dimension_numbers = #tpu.dot_dimension_numbers<[1], [0], [0], [1], [0, 0, 1, 1], [], []>} : vector<8x32xf32>, vector<32x192xf32>, vector<8x192xf32> -> vector<8x192xf32>
    %28 = vector.extract_strided_slice %27 {offsets = [0, 0], sizes = [8, 64], strides = [1, 1]} : vector<8x192xf32> to vector<8x64xf32>
    %cst_13 = arith.constant 2.500000e-01 : f32
    %29 = vector.broadcast %cst_13 : f32 to vector<8x64xf32>
    %30 = arith.mulf %28, %29 : vector<8x64xf32>
    %31 = vector.extract_strided_slice %27 {offsets = [0, 64], sizes = [8, 64], strides = [1, 1]} : vector<8x192xf32> to vector<8x64xf32>
    %32 = vector.extract_strided_slice %27 {offsets = [0, 128], sizes = [8, 64], strides = [1, 1]} : vector<8x192xf32> to vector<8x64xf32>
    %33 = tpu.iota {dimensions = array<i32: 0>} : vector<8x8xi32>
    %34 = tpu.iota {dimensions = array<i32: 1>} : vector<8x8xi32>
    %35 = arith.cmpi sle, %34, %33 : vector<8x8xi32>
    %c0_14 = arith.constant 0 : index
    %c0_15 = arith.constant 0 : index
    %36 = vector.load %arg5[%c0_14, %c0_15] : memref<64x32xf32, #tpu.memory_space<vmem>>, vector<64x32xf32>
    %cst_16 = arith.constant 0.000000e+00 : f32
    %37 = vector.broadcast %cst_16 : f32 to vector<8x32xf32>
    %38 = vector.extract_strided_slice %30 {offsets = [0, 0], sizes = [8, 16], strides = [1, 1]} : vector<8x64xf32> to vector<8x16xf32>
    %39 = vector.extract_strided_slice %31 {offsets = [0, 0], sizes = [8, 16], strides = [1, 1]} : vector<8x64xf32> to vector<8x16xf32>
    %40 = vector.extract_strided_slice %32 {offsets = [0, 0], sizes = [8, 16], strides = [1, 1]} : vector<8x64xf32> to vector<8x16xf32>
    %41 = tpu.transpose %39, [1, 0] : vector<8x16xf32> -> vector<16x8xf32>
    %cst_17 = arith.constant dense<0.000000e+00> : vector<8x8xf32>
    %42 = tpu.matmul %38, %41, %cst_17 {dimension_numbers = #tpu.dot_dimension_numbers<[1], [0], [0], [1], [0, 0, 1, 1], [], []>} : vector<8x16xf32>, vector<16x8xf32>, vector<8x8xf32> -> vector<8x8xf32>
    %cst_18 = arith.constant -1.000000e+30 : f32
    %43 = vector.broadcast %cst_18 : f32 to vector<8x8xf32>
    %44 = arith.select %35, %42, %43 : vector<8x8xi1>, vector<8x8xf32>
    %cst_19 = arith.constant dense<0xFF800000> : vector<8xf32>
    %45 = vector.multi_reduction <maximumf>, %44, %cst_19 [1] : vector<8x8xf32> to vector<8xf32>
    %46 = vector.shape_cast %45 : vector<8xf32> to vector<8x1xf32>
    %47 = vector.broadcast %46 : vector<8x1xf32> to vector<8x8xf32>
    %48 = arith.subf %44, %47 : vector<8x8xf32>
    %49 = math.exp %48 : vector<8x8xf32>
    %cst_20 = arith.constant dense<0.000000e+00> : vector<8xf32>
    %50 = vector.multi_reduction <add>, %49, %cst_20 [1] : vector<8x8xf32> to vector<8xf32>
    %51 = vector.shape_cast %50 : vector<8xf32> to vector<8x1xf32>
    %52 = tpu.reciprocal %51 {approx = true} : vector<8x1xf32> -> vector<8x1xf32>
    %53 = vector.broadcast %52 : vector<8x1xf32> to vector<8x8xf32>
    %54 = arith.mulf %49, %53 : vector<8x8xf32>
    %cst_21 = arith.constant dense<0.000000e+00> : vector<8x16xf32>
    %55 = tpu.matmul %54, %40, %cst_21 {dimension_numbers = #tpu.dot_dimension_numbers<[1], [0], [0], [1], [0, 0, 1, 1], [], []>} : vector<8x8xf32>, vector<8x16xf32>, vector<8x16xf32> -> vector<8x16xf32>
    %56 = vector.extract_strided_slice %36 {offsets = [0, 0], sizes = [16, 32], strides = [1, 1]} : vector<64x32xf32> to vector<16x32xf32>
    %cst_22 = arith.constant dense<0.000000e+00> : vector<8x32xf32>
    %57 = tpu.matmul %55, %56, %cst_22 {dimension_numbers = #tpu.dot_dimension_numbers<[1], [0], [0], [1], [0, 0, 1, 1], [], []>} : vector<8x16xf32>, vector<16x32xf32>, vector<8x32xf32> -> vector<8x32xf32>
    %58 = arith.addf %37, %57 : vector<8x32xf32>
    %59 = vector.extract_strided_slice %30 {offsets = [0, 16], sizes = [8, 16], strides = [1, 1]} : vector<8x64xf32> to vector<8x16xf32>
    %60 = vector.extract_strided_slice %31 {offsets = [0, 16], sizes = [8, 16], strides = [1, 1]} : vector<8x64xf32> to vector<8x16xf32>
    %61 = vector.extract_strided_slice %32 {offsets = [0, 16], sizes = [8, 16], strides = [1, 1]} : vector<8x64xf32> to vector<8x16xf32>
    %62 = tpu.transpose %60, [1, 0] : vector<8x16xf32> -> vector<16x8xf32>
    %cst_23 = arith.constant dense<0.000000e+00> : vector<8x8xf32>
    %63 = tpu.matmul %59, %62, %cst_23 {dimension_numbers = #tpu.dot_dimension_numbers<[1], [0], [0], [1], [0, 0, 1, 1], [], []>} : vector<8x16xf32>, vector<16x8xf32>, vector<8x8xf32> -> vector<8x8xf32>
    %cst_24 = arith.constant -1.000000e+30 : f32
    %64 = vector.broadcast %cst_24 : f32 to vector<8x8xf32>
    %65 = arith.select %35, %63, %64 : vector<8x8xi1>, vector<8x8xf32>
    %cst_25 = arith.constant dense<0xFF800000> : vector<8xf32>
    %66 = vector.multi_reduction <maximumf>, %65, %cst_25 [1] : vector<8x8xf32> to vector<8xf32>
    %67 = vector.shape_cast %66 : vector<8xf32> to vector<8x1xf32>
    %68 = vector.broadcast %67 : vector<8x1xf32> to vector<8x8xf32>
    %69 = arith.subf %65, %68 : vector<8x8xf32>
    %70 = math.exp %69 : vector<8x8xf32>
    %cst_26 = arith.constant dense<0.000000e+00> : vector<8xf32>
    %71 = vector.multi_reduction <add>, %70, %cst_26 [1] : vector<8x8xf32> to vector<8xf32>
    %72 = vector.shape_cast %71 : vector<8xf32> to vector<8x1xf32>
    %73 = tpu.reciprocal %72 {approx = true} : vector<8x1xf32> -> vector<8x1xf32>
    %74 = vector.broadcast %73 : vector<8x1xf32> to vector<8x8xf32>
    %75 = arith.mulf %70, %74 : vector<8x8xf32>
    %cst_27 = arith.constant dense<0.000000e+00> : vector<8x16xf32>
    %76 = tpu.matmul %75, %61, %cst_27 {dimension_numbers = #tpu.dot_dimension_numbers<[1], [0], [0], [1], [0, 0, 1, 1], [], []>} : vector<8x8xf32>, vector<8x16xf32>, vector<8x16xf32> -> vector<8x16xf32>
    %77 = vector.extract_strided_slice %36 {offsets = [16, 0], sizes = [16, 32], strides = [1, 1]} : vector<64x32xf32> to vector<16x32xf32>
    %cst_28 = arith.constant dense<0.000000e+00> : vector<8x32xf32>
    %78 = tpu.matmul %76, %77, %cst_28 {dimension_numbers = #tpu.dot_dimension_numbers<[1], [0], [0], [1], [0, 0, 1, 1], [], []>} : vector<8x16xf32>, vector<16x32xf32>, vector<8x32xf32> -> vector<8x32xf32>
    %79 = arith.addf %58, %78 : vector<8x32xf32>
    %80 = vector.extract_strided_slice %30 {offsets = [0, 32], sizes = [8, 16], strides = [1, 1]} : vector<8x64xf32> to vector<8x16xf32>
    %81 = vector.extract_strided_slice %31 {offsets = [0, 32], sizes = [8, 16], strides = [1, 1]} : vector<8x64xf32> to vector<8x16xf32>
    %82 = vector.extract_strided_slice %32 {offsets = [0, 32], sizes = [8, 16], strides = [1, 1]} : vector<8x64xf32> to vector<8x16xf32>
    %83 = tpu.transpose %81, [1, 0] : vector<8x16xf32> -> vector<16x8xf32>
    %cst_29 = arith.constant dense<0.000000e+00> : vector<8x8xf32>
    %84 = tpu.matmul %80, %83, %cst_29 {dimension_numbers = #tpu.dot_dimension_numbers<[1], [0], [0], [1], [0, 0, 1, 1], [], []>} : vector<8x16xf32>, vector<16x8xf32>, vector<8x8xf32> -> vector<8x8xf32>
    %cst_30 = arith.constant -1.000000e+30 : f32
    %85 = vector.broadcast %cst_30 : f32 to vector<8x8xf32>
    %86 = arith.select %35, %84, %85 : vector<8x8xi1>, vector<8x8xf32>
    %cst_31 = arith.constant dense<0xFF800000> : vector<8xf32>
    %87 = vector.multi_reduction <maximumf>, %86, %cst_31 [1] : vector<8x8xf32> to vector<8xf32>
    %88 = vector.shape_cast %87 : vector<8xf32> to vector<8x1xf32>
    %89 = vector.broadcast %88 : vector<8x1xf32> to vector<8x8xf32>
    %90 = arith.subf %86, %89 : vector<8x8xf32>
    %91 = math.exp %90 : vector<8x8xf32>
    %cst_32 = arith.constant dense<0.000000e+00> : vector<8xf32>
    %92 = vector.multi_reduction <add>, %91, %cst_32 [1] : vector<8x8xf32> to vector<8xf32>
    %93 = vector.shape_cast %92 : vector<8xf32> to vector<8x1xf32>
    %94 = tpu.reciprocal %93 {approx = true} : vector<8x1xf32> -> vector<8x1xf32>
    %95 = vector.broadcast %94 : vector<8x1xf32> to vector<8x8xf32>
    %96 = arith.mulf %91, %95 : vector<8x8xf32>
    %cst_33 = arith.constant dense<0.000000e+00> : vector<8x16xf32>
    %97 = tpu.matmul %96, %82, %cst_33 {dimension_numbers = #tpu.dot_dimension_numbers<[1], [0], [0], [1], [0, 0, 1, 1], [], []>} : vector<8x8xf32>, vector<8x16xf32>, vector<8x16xf32> -> vector<8x16xf32>
    %98 = vector.extract_strided_slice %36 {offsets = [32, 0], sizes = [16, 32], strides = [1, 1]} : vector<64x32xf32> to vector<16x32xf32>
    %cst_34 = arith.constant dense<0.000000e+00> : vector<8x32xf32>
    %99 = tpu.matmul %97, %98, %cst_34 {dimension_numbers = #tpu.dot_dimension_numbers<[1], [0], [0], [1], [0, 0, 1, 1], [], []>} : vector<8x16xf32>, vector<16x32xf32>, vector<8x32xf32> -> vector<8x32xf32>
    %100 = arith.addf %79, %99 : vector<8x32xf32>
    %101 = vector.extract_strided_slice %30 {offsets = [0, 48], sizes = [8, 16], strides = [1, 1]} : vector<8x64xf32> to vector<8x16xf32>
    %102 = vector.extract_strided_slice %31 {offsets = [0, 48], sizes = [8, 16], strides = [1, 1]} : vector<8x64xf32> to vector<8x16xf32>
    %103 = vector.extract_strided_slice %32 {offsets = [0, 48], sizes = [8, 16], strides = [1, 1]} : vector<8x64xf32> to vector<8x16xf32>
    %104 = tpu.transpose %102, [1, 0] : vector<8x16xf32> -> vector<16x8xf32>
    %cst_35 = arith.constant dense<0.000000e+00> : vector<8x8xf32>
    %105 = tpu.matmul %101, %104, %cst_35 {dimension_numbers = #tpu.dot_dimension_numbers<[1], [0], [0], [1], [0, 0, 1, 1], [], []>} : vector<8x16xf32>, vector<16x8xf32>, vector<8x8xf32> -> vector<8x8xf32>
    %cst_36 = arith.constant -1.000000e+30 : f32
    %106 = vector.broadcast %cst_36 : f32 to vector<8x8xf32>
    %107 = arith.select %35, %105, %106 : vector<8x8xi1>, vector<8x8xf32>
    %cst_37 = arith.constant dense<0xFF800000> : vector<8xf32>
    %108 = vector.multi_reduction <maximumf>, %107, %cst_37 [1] : vector<8x8xf32> to vector<8xf32>
    %109 = vector.shape_cast %108 : vector<8xf32> to vector<8x1xf32>
    %110 = vector.broadcast %109 : vector<8x1xf32> to vector<8x8xf32>
    %111 = arith.subf %107, %110 : vector<8x8xf32>
    %112 = math.exp %111 : vector<8x8xf32>
    %cst_38 = arith.constant dense<0.000000e+00> : vector<8xf32>
    %113 = vector.multi_reduction <add>, %112, %cst_38 [1] : vector<8x8xf32> to vector<8xf32>
    %114 = vector.shape_cast %113 : vector<8xf32> to vector<8x1xf32>
    %115 = tpu.reciprocal %114 {approx = true} : vector<8x1xf32> -> vector<8x1xf32>
    %116 = vector.broadcast %115 : vector<8x1xf32> to vector<8x8xf32>
    %117 = arith.mulf %112, %116 : vector<8x8xf32>
    %cst_39 = arith.constant dense<0.000000e+00> : vector<8x16xf32>
    %118 = tpu.matmul %117, %103, %cst_39 {dimension_numbers = #tpu.dot_dimension_numbers<[1], [0], [0], [1], [0, 0, 1, 1], [], []>} : vector<8x8xf32>, vector<8x16xf32>, vector<8x16xf32> -> vector<8x16xf32>
    %119 = vector.extract_strided_slice %36 {offsets = [48, 0], sizes = [16, 32], strides = [1, 1]} : vector<64x32xf32> to vector<16x32xf32>
    %cst_40 = arith.constant dense<0.000000e+00> : vector<8x32xf32>
    %120 = tpu.matmul %118, %119, %cst_40 {dimension_numbers = #tpu.dot_dimension_numbers<[1], [0], [0], [1], [0, 0, 1, 1], [], []>} : vector<8x16xf32>, vector<16x32xf32>, vector<8x32xf32> -> vector<8x32xf32>
    %121 = arith.addf %100, %120 : vector<8x32xf32>
    %c0_41 = arith.constant 0 : index
    %c0_42 = arith.constant 0 : index
    %122 = vector.load %arg6[%c0_41, %c0_42] : memref<1x32xf32, #tpu.memory_space<vmem>>, vector<1x32xf32>
    %123 = vector.broadcast %122 : vector<1x32xf32> to vector<8x32xf32>
    %124 = arith.addf %121, %123 : vector<8x32xf32>
    %c0_43 = arith.constant 0 : index
    %c0_44 = arith.constant 0 : index
    %c0_45 = arith.constant 0 : index
    %125 = vector.load %arg7[%c0_43, %c0_44, %c0_45] : memref<1x8x32xf32, #tpu.memory_space<vmem>>, vector<1x8x32xf32>
    %126 = vector.shape_cast %125 : vector<1x8x32xf32> to vector<8x32xf32>
    %127 = vector.shape_cast %124 : vector<8x32xf32> to vector<1x8x32xf32>
    tpu.vector_store %arg7[%c0_43, %c0_44, %c0_45], %127 {strides = array<i32>} : memref<1x8x32xf32, #tpu.memory_space<vmem>>, vector<1x8x32xf32>,
    return
  }
  func.func @transform_0(%arg0: i32) -> (i32, i32, i32) {
    %c0_i32 = arith.constant 0 : i32
    %c0_i32_0 = arith.constant 0 : i32
    %c0_i32_1 = arith.constant 0 : i32
    return %arg0, %c0_i32, %c0_i32_0 : i32, i32, i32
  }
  func.func @transform_1(%arg0: i32) -> (i32, i32) {
    %c0_i32 = arith.constant 0 : i32
    %c0_i32_0 = arith.constant 0 : i32
    %c0_i32_1 = arith.constant 0 : i32
    return %c0_i32, %c0_i32_0 : i32, i32
  }
  func.func @transform_2(%arg0: i32) -> (i32, i32) {
    %c0_i32 = arith.constant 0 : i32
    %c0_i32_0 = arith.constant 0 : i32
    %c0_i32_1 = arith.constant 0 : i32
    return %c0_i32, %c0_i32_0 : i32, i32
  }
  func.func @transform_3(%arg0: i32) -> (i32, i32) {
    %c0_i32 = arith.constant 0 : i32
    %c0_i32_0 = arith.constant 0 : i32
    %c0_i32_1 = arith.constant 0 : i32
    return %c0_i32, %c0_i32_0 : i32, i32
  }
  func.func @transform_4(%arg0: i32) -> (i32, i32) {
    %c0_i32 = arith.constant 0 : i32
    %c0_i32_0 = arith.constant 0 : i32
    %c0_i32_1 = arith.constant 0 : i32
    return %c0_i32, %c0_i32_0 : i32, i32
  }
  func.func @transform_5(%arg0: i32) -> (i32, i32) {
    %c0_i32 = arith.constant 0 : i32
    %c0_i32_0 = arith.constant 0 : i32
    %c0_i32_1 = arith.constant 0 : i32
    return %c0_i32, %c0_i32_0 : i32, i32
  }
  func.func @transform_6(%arg0: i32) -> (i32, i32, i32) {
    %c0_i32 = arith.constant 0 : i32
    %c0_i32_0 = arith.constant 0 : i32
    %c0_i32_1 = arith.constant 0 : i32
    return %arg0, %c0_i32, %c0_i32_0 : i32, i32, i32
  }
}

</mosaic_0001>

<bundles_post_ra>
// kernel: tpu_custom_call.1
= control target key start
LH: loop header
LB: loop body
LE: loop exit
PB: predicated region body
PF: predicated region fallthrough
CT: control target
= control target key end

     0   :  { %11 = vsyncpa [#allocation3], 0  ;;  %s2006_s0 = inlined_call_operand.vmem [shape: f32[2,8,32], index: 0, kind: input, shape index: {}]   ;;  %s2007_s1 = inlined_call_operand.vmem [shape: f32[1,32], index: 1, kind: input, shape index: {}]   ;;  %s2008_s2 = inlined_call_operand.vmem [shape: f32[1,32], index: 2, kind: input, shape index: {}]   ;;  %s2009_s3 = inlined_call_operand.vmem [shape: f32[32,192], index: 3, kind: input, shape index: {}]   ;;  %s2010_s4 = inlined_call_operand.vmem [shape: f32[64,32], index: 4, kind: input, shape index: {}]   ;;  %s2011_s5 = inlined_call_operand.vmem [shape: f32[1,32], index: 5, kind: input, shape index: {}]   ;;  %s2012_s6 = inlined_call_operand.hbm [shape: f32[2,8,32], index: 6, kind: output, shape index: {}]  }
   0x1   :  { %13 = vsyncpa [#allocation3 + $0x1], 0  ;;  %s1738_s21 = smov 0   ;;  %s1740_s22 = smov 0  }
   0x2   :  { %s1742_s23 = smov 0   ;;  %s1744_s24 = smov 0  }
   0x3 LB: > { %s1759_s25 = sadd.s32 4294967295, %s1690_s24   ;;  %s1415_s26 = sadd.s32 4294967294, %s1690_s24   ;;  %s1690_s24 = sphi %s1744_s24, %s2018_s24   ;;  %s1686_s23 = sphi %s1742_s23, %s2017_s23   ;;  %s1682_s22 = sphi %s1740_s22, %s2016_s22   ;;  %s1678_s21 = sphi %s1738_s21, %s2015_s21  }
   0x4   : > { %s1763_s27 = sadd.s32 1, %s1690_s24   ;;  %s157_s28 = sadd.s32 1, %s1686_s23 }
   0x5   : > { %s154_s29 = ssub.s32 %s1690_s24, %s1763_s27  ;;  %p167_p0 = scmp.ne.s32.totalorder %s1686_s23, %s1682_s22 }
   0x6   : > { %p155_p1 = scmp.eq.s32.totalorder %s154_s29, 0  ;;  %p168_p2 = scmp.eq.s32.totalorder %s1759_s25, 1 }
   0x7   : > { %p173_p3 = scmp.ne.s32.totalorder %s1682_s22, %s1678_s21  ;;  %p174_p4 = scmp.eq.s32.totalorder %s1415_s26, 1 }
   0x8   : > { %s1774_s30 = scalar_select %p155_p1, %s1686_s23, %s157_s28  }
   0x9   : > { %p1776_p5 = por %p168_p2, %p167_p0  ;;  %p1780_p6 = por %p174_p4, %p173_p3 }
   0xa   : > { %p1418_p7 = scmp.ge.s32.totalorder %s1690_s24, 1  ;;  %p214_p8 = scmp.lt.s32.totalorder %s1690_s24, 3 }
   0xc   : > { %p215_p9 = pnand %p1418_p7, %p214_p8 }
   0xd   : > { %p243_p10 = scmp.lt.s32.totalorder (!%p215_p9), %s1759_s25, 1  ;;  %vm248_vm0 = vcmask (!%p215_p9), 261120   ;;  %v280_v7 = vld [vmem:[%s2009_s3 + $0x8] sm:$0xff] (!%p215_p9)  ;;  %v282_v8 = vld [vmem:[%s2009_s3 + $0x18] sm:$0xff] (!%p215_p9)  ;;  %v279_v9 = vld [vmem:[%s2009_s3] sm:$0xff] (!%p215_p9)  ;;  %v1692_v14 = vmov (!%p215_p9), 0.0   ;;  %v362_v35 = vlaneseq (!%p215_p9) }
   0xe   : > { %218 = sbr.rel (%p215_p9) target bundleno = 2916 (0xb64), region = 44  ;;  %v1541_v10 = vpack.c.bf16 (!%p215_p9), %v282_v8, %v280_v7  ;;  %v281_v11 = vld [vmem:[%s2009_s3 + $0x10] sm:$0xff] (!%p215_p9)  ;;  %v284_v12 = vld [vmem:[%s2009_s3 + $0x28] sm:$0xff] (!%p215_p9)  ;;  %v286_v13 = vld [vmem:[%s2009_s3 + $0x38] sm:$0xff] (!%p215_p9)  ;;  %354 = vmatprep.mubr.f32.mxu0 (!%p215_p9), %v1692_v14  ;;  %1473 = vmatprep.subr.mxu1 (!%p215_p9), %v1692_v14  ;;  %vm1693_vm1 = vmmov (!%p215_p9), 0   ;;  %s1694_s19 = smov (!%p215_p9), 64  }
   0xf   : > { %v1543_v15 = vpack.c.bf16 (!%p215_p9), %v281_v11, %v279_v9  ;;  %v1545_v16 = vpack.c.bf16 (!%p215_p9), %v286_v13, %v284_v12  ;;  %v283_v17 = vld [vmem:[%s2009_s3 + $0x20] sm:$0xff] (!%p215_p9)  ;;  %v285_v18 = vld [vmem:[%s2009_s3 + $0x30] sm:$0xff] (!%p215_p9)  ;;  %1475 = vmatprep.mubr.msk.f32.mxu1 (!%p215_p9), %vm1693_vm1, %v1692_v14  ;;  %s1695_s20 = smov (!%p215_p9), 112   ;;  %s1696_s26 = smov (!%p215_p9), 48   ;;  %vm378_vm2 = vcmask (!%p215_p9), 130048   ;;  %v1854_v36 = vshrl.u32 (!%p215_p9), %v362_v35, 7 }
  0x10   : > { %1542 = vmatprep.subr.bf16.mxu0 (!%p215_p9), %v1541_v10  ;;  %v1547_v19 = vpack.c.bf16 (!%p215_p9), %v285_v18, %v283_v17  ;;  %v1421_v24 = vld [vmem:[%s2007_s1] ss:$0 sm:$0xff] (!%p215_p9)  ;;  %v1856_v37 = vand.u32 (!%p215_p9), 127, %v362_v35  ;;  %vm455_vm4 = vcmask (!%p215_p9), 64512   ;;  %s1697_s28 = smov (!%p215_p9), 32   ;;  %s1698_s29 = smov (!%p215_p9), 96  }
  0x11   : > { %1544 = vmatpush1.bf16.msra.mxu0 (!%p215_p9), %v1543_v15  ;;  %v1422_v26 = vld [vmem:[%s2008_s2] ss:$0 sm:$0xff] (!%p215_p9)  ;;  %v369_v56 = vld [vmem:[%s2010_s4 + $0x10] sm:$0xff] (!%p215_p9)  ;;  %v370_v57 = vld [vmem:[%s2010_s4 + $0x18] sm:$0xff] (!%p215_p9)  ;;  %v1699_v58 = vmov (!%p215_p9), 0.0|0.0   ;;  %s1700_s17 = smov (!%p215_p9), 80  }
  0x12   : > { %1546 = vmatprep.subr.bf16.mxu0 (!%p215_p9), %v1545_v16  ;;  %vm366_vm3 = vcmp.le.s32.totalorder (!%p215_p9), %v1856_v37, %v1854_v36  ;;  %v1550_v59 = vpack.c.bf16 (!%p215_p9), %v370_v57, %v369_v56  ;;  %s1701_s18 = smov (!%p215_p9), 16   ;;  %v373_v36 = vld [vmem:[%s2010_s4 + $0x30] sm:$0xff] (!%p215_p9)  ;;  %v374_v37 = vld [vmem:[%s2010_s4 + $0x38] sm:$0xff] (!%p215_p9)  ;;  %s240_s12 = sand.u32 (!%p215_p9), 1, %s1682_s22  }
  0x13   : > { %s1442_s16 = sshll.u32 (!%p215_p9), %s1759_s25, 7 }
  0x15   : > { %s244_s9 = scalar_select %p243_p10, %s1759_s25, 1  ;;  %1548 = vmatpush1.bf16.msra.mxu0 %v1547_v19 }
  0x16   : > { %1483 = vmatprep.subr.mxu0 %v1692_v14  ;;  %s1702_s25 = smov [#allocation2]  }
  0x17   : > { %s1420_s10 = sshll.u32 %s244_s9, 3  ;;  %s1632_s9 = sshll.u32 %s1702_s25, 4  ;;  %s1633_s9 = int_to_ptr.vmem [resolvable:$false] %s1632_s9 }
  0x18   : > { %s246_s13 = scalar_lea.vmem %s2006_s0, %s1420_s10  ;;  %s1634_s10 = scalar_lea.vmem %s1633_s9, 256 }
  0x19   : > { %v247_v0 = vld [vmem:[%s246_s13] sm:$0xff]  ;;  %s1419_s13 = sshll.u32 %s240_s12, 3 }
  0x1a   : > { %v249_v1 = vsel %vm248_vm0, %v247_v0, 0.0 }
  0x1b   : > { %250 = vadd.xlane.f32.xlu0 %v249_v1  ;;  %v368_v1 = vld [vmem:[%s2010_s4 + $0x8] sm:$0xff] }
  0xa8   : > { %v251_v2 = vpop.xlane.xlu0 %250 }
  0xa9   : > { %v253_v3 = vmul.f32 0.03125, %v251_v2 }
  0xab   : > { %v254_v4 = vsub.f32 %v247_v0, %v253_v3  ;;  %v367_v0 = vld [vmem:[%s2010_s4] sm:$0xff] }
  0xad   : > { %v255_v5 = vmul.f32 %v254_v4, %v254_v4 }
  0xaf   : > { %v256_v6 = vsel %vm248_vm0, %v255_v5, 0.0 }
  0xb0   : > { %257 = vadd.xlane.f32.xlu0 %v256_v6 }
 0x13d   : > { %v258_v20 = vpop.xlane.xlu0 %257 }
 0x13e   : > { %v259_v21 = vmul.f32 0.03125, %v258_v20 }
 0x140   : > { %v260_v22 = vadd.f32 1e-05, %v259_v21 }
 0x142   : > { %1610 = vrsqrt.f32 %v260_v22 }
 0x14c   : > { %v1611_v23 = vpop.eup %1610 }
 0x14d   : > { %v262_v25 = vmul.f32 %v1611_v23, %v254_v4  ;;  %v1553_v4 = vpack.c.bf16 %v368_v1, %v367_v0 }
 0x14f   : > { %v270_v27 = vmul.f32 %v1421_v24, %v262_v25 }
 0x151   : > { %v278_v28 = vadd.f32 %v1422_v26, %v270_v27 }
 0x153   : > { %1423 = vmatmul.mubr.msk.f32.vlgmr.msra.gmra.mrb[0].mxu0 %vm248_vm0, %v278_v28  ;;  %v371_v28 = vld [vmem:[%s2010_s4 + $0x20] sm:$0xff] }
 0x154   : > { %1485 = vmatprep.mubr.msk.f32.mxu0 %vm1693_vm1, %v1692_v14 }
 0x226   : > { %v1831_v29 = vpop.f32.mrb[0].mxu0 }
 0x227   : > { %376 = vrot.lane.b32.xlu1 %v1831_v29, %s1694_s19  ;;  %v1834_v30 = vpop.f32.mrb[1].mxu0  ;;  %v1837_v31 = vmul.f32 0.25, %v1831_v29 }
 0x229   : > { %540 = vrot.lane.b32.xlu0 %v1837_v31, %s1695_s20 }
 0x22b   : > { %542 = vrot.lane.b32.xlu1 %v1831_v29, %s1696_s26  ;;  %s1963_s26 = scalar_lea.hbm %s2012_s6, %s1442_s16 }
 0x299   : > { %v377_v32 = vpop.permute.xlu1 %376 }
 0x29a   : > { %1474 = vmatpush3.xpose.msk.msra.mxu1 %vm378_vm2, %v377_v32 }
 0x29b   : > { %1478 = vmatprep.subr.mxu1 %v1692_v14  ;;  %v541_v34 = vpop.permute.xlu0 %540 }
 0x29d   : > { %v543_v33 = vpop.permute.xlu1 %542  ;;  %1476 = vmatmul.mubr.msk.f32.vlgmr.msra.gmra.mrb[0].mxu1 %vm378_vm2, %v1837_v31 }
 0x29e   : > { %1479 = vmatpush3.msra.mxu1 %v1834_v30  ;;  %1484 = vmatpush3.xpose.msk.msra.mxu0 %vm378_vm2, %v543_v33 }
 0x29f   : > { %1480 = vmatprep.mubr.msk.f32.mxu1 %vm1693_vm1, %v1692_v14  ;;  %1488 = vmatprep.subr.mxu1 %v1692_v14 }
 0x2a0   : > { %1549 = vmatprep.subr.bf16.mxu0 %v1699_v58 }
 0x2a1   : > { %1486 = vmatmul.mubr.msk.f32.vlgmr.msra.gmra.mrb[2].mxu0 %vm378_vm2, %v541_v34 }
 0x2a2   : > { %1497 = vmatprep.mubr.msk.f32.mxu0 %vm1693_vm1, %v1692_v14  ;;  %1551 = vmatpush3.bf16.msra.mxu0 %v1550_v59  ;;  %v1440_v59 = vld [vmem:[%s2011_s5] ss:$0 sm:$0xff] }
 0x2a3   : > { %1507 = vmatprep.subr.mxu0 %v1692_v14 }
 0x370   : > { %v450_v38 = vpop.f32.mrb[0].mxu1 }
 0x371   : > { %v454_v39 = vsel %vm366_vm3, %v450_v38, -1e+30  ;;  %v1477_v40 = vpop.f32.mrb[1].mxu1 }
 0x372   : > { %v456_v41 = vsel %vm455_vm4, %v454_v39, -inf }
 0x373   : > { %457 = vmax.xlane.f32.xlu1 %v456_v41 }
 0x374   : > { %v614_v42 = vpop.f32.mrb[2].mxu0 }
 0x375   : > { %v618_v43 = vsel %vm366_vm3, %v614_v42, -1e+30  ;;  %v1487_v44 = vpop.f32.mrb[3].mxu0 }
 0x376   : > { %v619_v45 = vsel %vm455_vm4, %v618_v43, -inf }
 0x377   : > { %620 = vmax.xlane.f32.xlu0 %v619_v45 }
 0x38d   : > { %855 = vrot.lane.b32.xlu0 %v1831_v29, %s1697_s28  ;;  %s1343_s28 = scalar_lea.sflag [#allocation3], %s240_s12 }
 0x400   : > { %v458_v46 = vpop.xlane.xlu1 %457 }
 0x401   : > { %v459_v47 = vsub.f32 %v454_v39, %v458_v46 }
 0x403   : > { %v460_v48 = vmul.f32 1.442695, %v459_v47 }
 0x404   : > { %v621_v49 = vpop.xlane.xlu0 %620 }
 0x405   : > { %1612 = vpow2.f32 %v460_v48  ;;  %v622_v50 = vsub.f32 %v618_v43, %v621_v49 }
 0x407   : > { %v623_v51 = vmul.f32 1.442695, %v622_v50 }
 0x408   : > { %v856_v9 = vpop.permute.xlu0 %855 }
 0x409   : > { %1614 = vpow2.f32 %v623_v51 }
 0x40f   : > { %v1613_v52 = vpop.eup %1612 }
 0x410   : > { %v462_v53 = vsel %vm455_vm4, %v1613_v52, 0.0 }
 0x411   : > { %463 = vadd.xlane.f32.xlu1 %v462_v53 }
 0x413   : > { %v1615_v54 = vpop.eup %1614 }
 0x414   : > { %v625_v55 = vsel %vm455_vm4, %v1615_v54, 0.0 }
 0x415   : > { %626 = vadd.xlane.f32.xlu1 %v625_v55 }
 0x426   : > { %631 = vrot.lane.b32.xlu1 %v1834_v30, %s1695_s20 }
 0x42a   : > { %853 = vrot.lane.b32.xlu1 %v1837_v31, %s1698_s29 }
 0x49e   : > { %v464_v60 = vpop.xlane.xlu1 %463 }
 0x49f   : > { %1616 = vrcp.f32 %v464_v60 }
 0x4a2   : > { %v627_v61 = vpop.xlane.xlu1 %626 }
 0x4a3   : > { %1618 = vrcp.f32 %v627_v61 }
 0x4a6   : > { %v632_v2 = vpop.permute.xlu1 %631 }
 0x4a9   : > { %v1617_v62 = vpop.eup %1616 }
 0x4aa   : > { %v466_v63 = vmul.f32 %v1617_v62, %v1613_v52  ;;  %v854_v11 = vpop.permute.xlu1 %853 }
 0x4ac   : > { %1481 = vmatmul.mubr.msk.f32.vlgmr.msra.gmra.mrb[2].mxu1 %vm455_vm4, %v466_v63 }
 0x4ad   : > { %v1619_v3 = vpop.eup %1618  ;;  %1489 = vmatpush3.msra.mxu1 %v632_v2  ;;  %1490 = vmatprep.mubr.msk.f32.mxu1 %vm1693_vm1, %v1692_v14 }
 0x4ae   : > { %v629_v5 = vmul.f32 %v1619_v3, %v1615_v54  ;;  %1552 = vmatprep.subr.bf16.mxu1 %v1699_v58 }
 0x4b0   : > { %1491 = vmatmul.mubr.msk.f32.vlgmr.msra.gmra.mrb[4].mxu1 %vm455_vm4, %v629_v5 }
 0x4b1   : > { %1554 = vmatpush3.bf16.msra.mxu1 %v1553_v4  ;;  %1504 = vmatprep.mubr.msk.f32.mxu1 %vm1693_vm1, %v1692_v14 }
 0x4b2   : > { %1512 = vmatprep.subr.mxu1 %v1692_v14 }
 0x57f   : > { %v536_v6 = vpop.f32.mrb[2].mxu1 }
 0x580   : > { %v1482_v7 = vpop.f32.mrb[3].mxu1  ;;  %1505 = vmatmul.mubr.msk.f32.vlgmr.msra.gmra.mrb[6].mxu1 %vm378_vm2, %v536_v6 }
 0x581   : > { %1514 = vmatprep.mubr.msk.f32.mxu1 %vm1693_vm1, %v1692_v14 }
 0x583   : > { %v703_v8 = vpop.f32.mrb[4].mxu1 }
 0x584   : > { %v1492_v10 = vpop.f32.mrb[5].mxu1  ;;  %1498 = vmatmul.mubr.msk.f32.vlgmr.msra.gmra.mrb[4].mxu0 %vm378_vm2, %v703_v8 }
 0x585   : > { %1508 = vmatpush3.xpose.msk.msra.mxu0 %vm378_vm2, %v856_v9  ;;  %1509 = vmatprep.mubr.msk.f32.mxu0 %vm1693_vm1, %v1692_v14 }
 0x586   : > { %1555 = vmatprep.subr.bf16.mxu0 %v1699_v58 }
 0x588   : > { %1510 = vmatmul.mubr.msk.f32.vlgmr.msra.gmra.mrb[6].mxu0 %vm378_vm2, %v854_v11 }
 0x589   : > { %1521 = vmatprep.mubr.msk.f32.mxu0 %vm1693_vm1, %v1692_v14 }
 0x653   : > { %v849_v12 = vpop.f32.mrb[6].mxu1 }
 0x654   : > { %v1506_v13 = vpop.f32.mrb[7].mxu1 }
 0x657   : > { %v776_v15 = vpop.f32.mrb[4].mxu0 }
 0x658   : > { %v1908_v16 = vadd.f32 %v849_v12, %v776_v15  ;;  %v1499_v17 = vpop.f32.mrb[5].mxu0 }
 0x65b   : > { %v927_v18 = vpop.f32.mrb[6].mxu0 }
 0x65c   : > { %v931_v19 = vsel %vm366_vm3, %v927_v18, -1e+30  ;;  %v1511_v20 = vpop.f32.mrb[7].mxu0 }
 0x65d   : > { %v932_v21 = vsel %vm455_vm4, %v931_v19, -inf }
 0x65e   : > { %933 = vmax.xlane.f32.xlu1 %v932_v21 }
 0x66f   : > { %943 = vrot.lane.b32.xlu1 %v1834_v30, %s1698_s29 }
 0x673   : > { %1093 = vrot.lane.b32.xlu1 %v1837_v31, %s1700_s17  ;;  %v372_v31 = vld [vmem:[%s2010_s4 + $0x28] sm:$0xff] }
 0x674   : > { %v1556_v32 = vpack.c.bf16 %v372_v31, %v371_v28 }
 0x676   : > { %1557 = vmatpush3.bf16.msra.mxu0 %v1556_v32 }
 0x677   : > { %1529 = vmatprep.subr.mxu0 %v1692_v14 }
 0x6eb   : > { %v934_v22 = vpop.xlane.xlu1 %933 }
 0x6ec   : > { %v935_v23 = vsub.f32 %v931_v19, %v934_v22 }
 0x6ee   : > { %v936_v24 = vmul.f32 1.442695, %v935_v23 }
 0x6ef   : > { %v944_v25 = vpop.permute.xlu1 %943 }
 0x6f0   : > { %1620 = vpow2.f32 %v936_v24  ;;  %1513 = vmatpush3.msra.mxu1 %v944_v25 }
 0x6f1   : > { %1524 = vmatprep.subr.mxu1 %v1692_v14 }
 0x6fa   : > { %v1621_v26 = vpop.eup %1620 }
 0x6fb   : > { %v938_v27 = vsel %vm455_vm4, %v1621_v26, 0.0 }
 0x6fc   : > { %939 = vadd.xlane.f32.xlu0 %v938_v27 }
 0x712   : > { %1095 = vrot.lane.b32.xlu0 %v1831_v29, %s1701_s18  ;;  %v1094_v29 = vpop.permute.xlu1 %1093 }
 0x789   : > { %v940_v33 = vpop.xlane.xlu0 %939 }
 0x78a   : > { %1622 = vrcp.f32 %v940_v33 }
 0x78d   : > { %v1096_v38 = vpop.permute.xlu0 %1095 }
 0x794   : > { %v1623_v34 = vpop.eup %1622 }
 0x795   : > { %v942_v35 = vmul.f32 %v1623_v34, %v1621_v26 }
 0x797   : > { %1515 = vmatmul.mubr.msk.f32.vlgmr.msra.gmra.mrb[8].mxu1 %vm455_vm4, %v942_v35 }
 0x798   : > { %1525 = vmatpush3.xpose.msk.msra.mxu1 %vm378_vm2, %v1096_v38  ;;  %1526 = vmatprep.mubr.msk.f32.mxu1 %vm1693_vm1, %v1692_v14 }
 0x799   : > { %1558 = vmatprep.subr.bf16.mxu1 %v1699_v58 }
 0x79b   : > { %1527 = vmatmul.mubr.msk.f32.vlgmr.msra.gmra.mrb[10].mxu1 %vm378_vm2, %v1094_v29 }
 0x79c   : > { %1538 = vmatprep.mubr.msk.f32.mxu1 %vm1693_vm1, %v1692_v14 }
 0x86a   : > { %v1015_v39 = vpop.f32.mrb[8].mxu1 }
 0x86b   : > { %v1516_v40 = vpop.f32.mrb[9].mxu1  ;;  %1522 = vmatmul.mubr.msk.f32.vlgmr.msra.gmra.mrb[8].mxu0 %vm378_vm2, %v1015_v39 }
 0x86c   : > { %1531 = vmatprep.mubr.msk.f32.mxu0 %vm1693_vm1, %v1692_v14 }
 0x86e   : > { %v1167_v41 = vpop.f32.mrb[10].mxu1 }
 0x86f   : > { %v1171_v42 = vsel %vm366_vm3, %v1167_v41, -1e+30  ;;  %v1528_v43 = vpop.f32.mrb[11].mxu1 }
 0x870   : > { %v1172_v44 = vsel %vm455_vm4, %v1171_v42, -inf }
 0x871   : > { %1173 = vmax.xlane.f32.xlu1 %v1172_v44 }
 0x882   : > { %1183 = vrot.lane.b32.xlu1 %v1834_v30, %s1700_s17  ;;  %v1559_v30 = vpack.c.bf16 %v374_v37, %v373_v36  ;;  %s242_s17 = scalar_lea.vmem [#allocation2], %s1419_s13 }
 0x883   : > { %s1356_s18 = sshll.u32 %s242_s17, 4  ;;  %s1965_s18 = int_to_ptr.vmem [resolvable:$true] %s1356_s18 }
 0x884   : > { %1560 = vmatpush3.bf16.msra.mxu1 %v1559_v30  ;;  %s1628_s29 = scalar_lea.vmem %s1965_s18, 128  ;;  %p1635_p0 = scmp.lt.s32.totalorder %s1965_s18, %s1633_s9 }
 0x885   : > { %p1629_p11 = scmp.ne.s32.totalorder %s1965_s18, %s1628_s29  ;;  %p1636_p1 = scmp.lt.s32.totalorder %s1634_s10, %s1628_s29 }
 0x887   : > { %p1630_p12 = pnand %p1629_p11, %p1776_p5  ;;  %p1637_p2 = por %p1636_p1, %p1635_p0 }
 0x889   : > { %p1631_p13 = pneg %p1630_p12 }
 0x88b   : > { %p1638_p3 = pnand %p1637_p2, %p1631_p13 }
 0x8fe   : > { %v1174_v45 = vpop.xlane.xlu1 %1173 }
 0x8ff   : > { %v1175_v46 = vsub.f32 %v1171_v42, %v1174_v45 }
 0x901   : > { %v1176_v47 = vmul.f32 1.442695, %v1175_v46 }
 0x902   : > { %v1184_v48 = vpop.permute.xlu1 %1183 }
 0x903   : > { %1624 = vpow2.f32 %v1176_v47  ;;  %1530 = vmatpush3.msra.mxu0 %v1184_v48 }
 0x90d   : > { %v1625_v49 = vpop.eup %1624 }
 0x90e   : > { %v1178_v14 = vsel %vm455_vm4, %v1625_v49, 0.0 }
 0x90f   : > { %1179 = vadd.xlane.f32.xlu0 %v1178_v14 }
 0x93e   : > { %v1088_v50 = vpop.f32.mrb[8].mxu0 }
 0x93f   : > { %v1092_v51 = vadd.f32 %v1088_v50, %v1908_v16  ;;  %v1523_v52 = vpop.f32.mrb[9].mxu0 }
 0x99c   : > { %v1180_v53 = vpop.xlane.xlu0 %1179 }
 0x99d   : > { %1626 = vrcp.f32 %v1180_v53 }
 0x9a7   : > { %v1627_v54 = vpop.eup %1626 }
 0x9a8   : > { %v1182_v55 = vmul.f32 %v1627_v54, %v1625_v49 }
 0x9aa   : > { %1532 = vmatmul.mubr.msk.f32.vlgmr.msra.gmra.mrb[10].mxu0 %vm455_vm4, %v1182_v55 }
 0xa7d   : > { %v1255_v56 = vpop.f32.mrb[10].mxu0 }
 0xa7e   : > { %v1533_v57 = vpop.f32.mrb[11].mxu0  ;;  %1539 = vmatmul.mubr.msk.f32.vlgmr.msra.gmra.mrb[12].mxu1 %vm378_vm2, %v1255_v56 }
 0xb51   : > { %v1328_v58 = vpop.f32.mrb[12].mxu1 }
 0xb52   : > { %v1332_v60 = vadd.f32 %v1328_v58, %v1092_v51  ;;  %v1540_v61 = vpop.f32.mrb[13].mxu1 }
 0xb54   : > { %v1340_v62 = vadd.f32 %v1440_v59, %v1332_v60 }
 0xb56   : > { %1341 = vst.msk [vmem:[%s242_s17] sm:$0xff] %vm248_vm0, %v1340_v62 }
 0xb57   : > { %1641 = shalt.err (!%p1638_p3)
}
 0xb58   : > { %s1642_s11 = scalar_lea.hbm %s1963_s26, 128  ;;  %s1646_s14 = scalar_lea.hbm %s2012_s6, 256 }
 0xb59   : > { %p1643_p4 = scmp.ne.s32.totalorder %s1963_s26, %s1642_s11  ;;  %p1647_p9 = scmp.lt.u32.totalorder %s1963_s26, %s2012_s6 }
 0xb5a   : > { %p1648_p10 = scmp.lt.u32.totalorder %s1646_s14, %s1642_s11  ;;  %p1650_p12 = scmp.lt.u32.totalorder %s1642_s11, %s1963_s26 }
 0xb5b   : > { %p1644_p7 = pnand %p1643_p4, %p1776_p5 }
 0xb5c   : > { %p1649_p11 = por %p1648_p10, %p1647_p9 }
 0xb5d   : > { %p1645_p8 = pneg %p1644_p7 }
 0xb5e   : > { %p1651_p13 = por %p1650_p12, %p1649_p11 }
 0xb60   : > { %p1652_p0 = pnand %p1651_p13, %p1645_p8 }
 0xb62   : > { %1655 = shalt.err (!%p1652_p0)
}
 0xb63   : > { %1561 = dma.vmem_to_hbm [thread:$0]  (%p1776_p5), %s1965_s18, 128, %s1963_s26, %s1343_s28  }
 0xb64 PF: > { %p1567_p1 = scmp.ge.s32.totalorder %s1690_s24, 2  ;;  %s1368_s17 = sand.u32 1, %s1678_s21  }
 0xb65   : > { %s1369_s19 = scalar_lea.sflag [#allocation3], %s1368_s17 }
 0xb66   : > { %p1564_p2 = pnand %p1567_p1, %p1780_p6 }
 0xb68   : > { %1673 = dma.done.wait (!%p1564_p2), %s1369_s19, 128  }
 0xb69   : > { %1675 = vsyncadd (!%p1564_p2), %s1369_s19, 4294967168  ;;  %p16_p3 = scmp.ge.s32.totalorder %s1763_s27, 4   ;;  %s2015_s21 = smov %s1682_s22 }
 0xb6a   : > { %s2016_s22 = smov %s1686_s23  ;;  %s2017_s23 = smov %s1774_s30 }
 0xb6b   : > { %s2018_s24 = smov %s1763_s27  ;;  %18 = sbr.rel (!%p16_p3) target bundleno = 3 (0x3), region = 79 }
 0xb72   :  { %1374 = vsyncpa [#allocation3], 1 }
 0xb73   :  { %1376 = vsyncpa [#allocation3 + $0x1], 1 }

</bundles_post_ra>
